<compile_context>
chip_gen: v7x
topology: tpu7x:2x2x1
jax: 0.10.0
libtpu: 0.0.40
codegen_flags: <defaults>
</compile_context>

<pallas_src>
import jax
import jax.numpy as jnp
from jax.experimental import pallas as pl
from jax.experimental.pallas import tpu as pltpu


def qnetwork_kernel(x_ref, w1_ref, b1_ref, w2_ref, b2_ref, o_ref):
    # fc1: (TB,42)bf16 @ (42,128)bf16 -> f32 accum, +bias, ReLU
    h = jnp.dot(x_ref[...], w1_ref[...], preferred_element_type=jnp.float32)
    h = jnp.maximum(h + b1_ref[...], 0.0)
    # fc2: (TB,128)bf16 @ (128,128)bf16 -> f32 accum, +bias; lane-dense 128-wide store
    y = jnp.dot(h.astype(w2_ref.dtype), w2_ref[...],
                preferred_element_type=jnp.float32)
    o_ref[...] = (y + b2_ref[...]).astype(o_ref.dtype)


def qnetwork_forward(x, w1, b1, w2, b2, *, tb=512):
    """x: (B, 42) f32.  w1: (42,128), b1: (1,128), w2: (128,7), b2: (1,7)."""
    B, in_dim = x.shape
    hid = w1.shape[1]
    out_dim = w2.shape[1]

    # --- lane-dense output: pad fc2 out dim up to a multiple of 128 (here exactly 128)
    LANE = 128
    out_pad = ((out_dim + LANE - 1) // LANE) * LANE
    w2p = jnp.zeros((hid, out_pad), w2.dtype).at[:, :out_dim].set(w2)
    b2p = jnp.zeros((1, out_pad), b2.dtype).at[:, :out_dim].set(b2)

    # --- batch tiling: TB multiple of 16 (bf16 sublane pack), pad B up to a tile ---
    SUB = 16
    TB = min(tb, max(SUB, ((B + SUB - 1) // SUB) * SUB))
    Bp = ((B + TB - 1) // TB) * TB
    xp = x if Bp == B else jnp.zeros((Bp, in_dim), x.dtype).at[:B].set(x)

    # --- bf16 operands (halve HBM traffic), f32 accumulation in-kernel ---
    xb = xp.astype(jnp.bfloat16)
    w1b = w1.astype(jnp.bfloat16)
    w2b = w2p.astype(jnp.bfloat16)
    b1f = b1.astype(jnp.float32)
    b2f = b2p.astype(jnp.float32)

    grid = (Bp // TB,)
    out = pl.pallas_call(
        qnetwork_kernel,
        out_shape=jax.ShapeDtypeStruct((Bp, out_pad), jnp.float32),
        grid_spec=pl.GridSpec(
            grid=grid,
            in_specs=[
                # x: tiled along batch
                pl.BlockSpec((TB, in_dim), lambda i: (i, 0)),
                # weights / biases: constant block index -> resident in VMEM
                pl.BlockSpec((in_dim, hid), lambda i: (0, 0)),
                pl.BlockSpec((1, hid), lambda i: (0, 0)),
                pl.BlockSpec((hid, out_pad), lambda i: (0, 0)),
                pl.BlockSpec((1, out_pad), lambda i: (0, 0)),
            ],
            out_specs=pl.BlockSpec((TB, out_pad), lambda i: (i, 0)),
        ),
        compiler_params=pltpu.CompilerParams(
            dimension_semantics=("parallel",)),
    )(xb, w1b, b1f, w2b, b2f)

    # slice away batch padding and lane padding outside the kernel
    return out[:B, :out_dim]


def init_params(key):
    """Deterministic init mimicking torch.nn.Linear's U(-1/sqrt(fan_in), 1/sqrt(fan_in))."""
    k1, k2, k3, k4 = jax.random.split(key, 4)
    in1, hid, out = 42, 128, 7
    bound1 = 1.0 / jnp.sqrt(in1)
    bound2 = 1.0 / jnp.sqrt(hid)
    w1 = jax.random.uniform(k1, (in1, hid), jnp.float32, -bound1, bound1)
    b1 = jax.random.uniform(k2, (1, hid), jnp.float32, -bound1, bound1)
    w2 = jax.random.uniform(k3, (hid, out), jnp.float32, -bound2, bound2)
    b2 = jax.random.uniform(k4, (1, out), jnp.float32, -bound2, bound2)
    return w1, b1, w2, b2


if __name__ == "__main__":
    key = jax.random.PRNGKey(0)
    kx, kp = jax.random.split(key)
    B = 8
    x = jax.random.normal(kx, (B, 42), jnp.float32)
    w1, b1, w2, b2 = init_params(kp)

    out = qnetwork_forward(x, w1, b1, w2, b2)
    jax.block_until_ready(out)
    assert out.shape == (B, 7)

    # Reference mirroring the kernel's bf16-operand / f32-accumulate math.
    xb = x.astype(jnp.bfloat16)
    h = jnp.dot(xb, w1.astype(jnp.bfloat16), preferred_element_type=jnp.float32) + b1
    h = jnp.maximum(h, 0.0)
    ref = jnp.dot(h.astype(jnp.bfloat16), w2.astype(jnp.bfloat16),
                  preferred_element_type=jnp.float32) + b2
    assert jnp.allclose(out, ref, atol=1e-3, rtol=1e-3), \
        f"max err {jnp.max(jnp.abs(out - ref))}"

    # Sanity vs pure f32 reference (loose tolerance for bf16 operand rounding).
    ref_f32 = jnp.maximum(x @ w1 + b1, 0.0) @ w2 + b2
    assert jnp.allclose(out, ref_f32, atol=5e-2, rtol=5e-2)

    print("KERNEL_OK")
</pallas_src>

<mosaic_0001>
module attributes {stable_mosaic.version = 11 : i64} {
  func.func @qnetwork_kernel(%arg0: i32, %arg1: memref<16x42xbf16, #tpu.memory_space<vmem>>, %arg2: memref<42x128xbf16, #tpu.memory_space<vmem>>, %arg3: memref<1x128xf32, #tpu.memory_space<vmem>>, %arg4: memref<128x128xbf16, #tpu.memory_space<vmem>>, %arg5: memref<1x128xf32, #tpu.memory_space<vmem>>, %arg6: memref<16x128xf32, #tpu.memory_space<vmem>>) attributes {dimension_semantics = [#tpu.dimension_semantics<parallel>], iteration_bounds = array<i64: 1>, scalar_prefetch = 0 : i64, scratch_operands = 0 : i64, tpu.core_type = #tpu.core_type<tc>, window_params = [{transform_indices = @transform_0, window_bounds = array<i64: 16, 42>}, {pipeline_mode = #tpu.pipeline_mode<synchronous>, transform_indices = @transform_1, window_bounds = array<i64: 42, 128>}, {pipeline_mode = #tpu.pipeline_mode<synchronous>, transform_indices = @transform_2, window_bounds = array<i64: 1, 128>}, {pipeline_mode = #tpu.pipeline_mode<synchronous>, transform_indices = @transform_3, window_bounds = array<i64: 128, 128>}, {pipeline_mode = #tpu.pipeline_mode<synchronous>, transform_indices = @transform_4, window_bounds = array<i64: 1, 128>}, {transform_indices = @transform_5, window_bounds = array<i64: 16, 128>}]} {
    %c0 = arith.constant 0 : index
    %c0_0 = arith.constant 0 : index
    %0 = vector.load %arg1[%c0, %c0_0] : memref<16x42xbf16, #tpu.memory_space<vmem>>, vector<16x42xbf16>
    %c0_1 = arith.constant 0 : index
    %c0_2 = arith.constant 0 : index
    %1 = vector.load %arg2[%c0_1, %c0_2] : memref<42x128xbf16, #tpu.memory_space<vmem>>, vector<42x128xbf16>
    %cst = arith.constant dense<0.000000e+00> : vector<16x128xf32>
    %2 = tpu.matmul %0, %1, %cst {dimension_numbers = #tpu.dot_dimension_numbers<[1], [0], [0], [1], [0, 0, 1, 1], [], []>} : vector<16x42xbf16>, vector<42x128xbf16>, vector<16x128xf32> -> vector<16x128xf32>
    %c0_3 = arith.constant 0 : index
    %c0_4 = arith.constant 0 : index
    %3 = vector.load %arg3[%c0_3, %c0_4] : memref<1x128xf32, #tpu.memory_space<vmem>>, vector<1x128xf32>
    %4 = vector.broadcast %3 : vector<1x128xf32> to vector<16x128xf32>
    %5 = arith.addf %2, %4 : vector<16x128xf32>
    %cst_5 = arith.constant 0.000000e+00 : f32
    %6 = vector.broadcast %cst_5 : f32 to vector<16x128xf32>
    %7 = arith.maximumf %5, %6 : vector<16x128xf32>
    %8 = arith.truncf %7 : vector<16x128xf32> to vector<16x128xbf16>
    %c0_6 = arith.constant 0 : index
    %c0_7 = arith.constant 0 : index
    %9 = vector.load %arg4[%c0_6, %c0_7] : memref<128x128xbf16, #tpu.memory_space<vmem>>, vector<128x128xbf16>
    %cst_8 = arith.constant dense<0.000000e+00> : vector<16x128xf32>
    %10 = tpu.matmul %8, %9, %cst_8 {dimension_numbers = #tpu.dot_dimension_numbers<[1], [0], [0], [1], [0, 0, 1, 1], [], []>} : vector<16x128xbf16>, vector<128x128xbf16>, vector<16x128xf32> -> vector<16x128xf32>
    %c0_9 = arith.constant 0 : index
    %c0_10 = arith.constant 0 : index
    %11 = vector.load %arg5[%c0_9, %c0_10] : memref<1x128xf32, #tpu.memory_space<vmem>>, vector<1x128xf32>
    %12 = vector.broadcast %11 : vector<1x128xf32> to vector<16x128xf32>
    %13 = arith.addf %10, %12 : vector<16x128xf32>
    %c0_11 = arith.constant 0 : index
    %c0_12 = arith.constant 0 : index
    %14 = vector.load %arg6[%c0_11, %c0_12] : memref<16x128xf32, #tpu.memory_space<vmem>>, vector<16x128xf32>
    tpu.vector_store %arg6[%c0_11, %c0_12], %13 {strides = array<i32>} : memref<16x128xf32, #tpu.memory_space<vmem>>, vector<16x128xf32>,
    return
  }
  func.func @transform_0(%arg0: i32) -> (i32, i32) {
    %c0_i32 = arith.constant 0 : i32
    %c0_i32_0 = arith.constant 0 : i32
    return %arg0, %c0_i32 : i32, i32
  }
  func.func @transform_1(%arg0: i32) -> (i32, i32) {
    %c0_i32 = arith.constant 0 : i32
    %c0_i32_0 = arith.constant 0 : i32
    %c0_i32_1 = arith.constant 0 : i32
    return %c0_i32, %c0_i32_0 : i32, i32
  }
  func.func @transform_2(%arg0: i32) -> (i32, i32) {
    %c0_i32 = arith.constant 0 : i32
    %c0_i32_0 = arith.constant 0 : i32
    %c0_i32_1 = arith.constant 0 : i32
    return %c0_i32, %c0_i32_0 : i32, i32
  }
  func.func @transform_3(%arg0: i32) -> (i32, i32) {
    %c0_i32 = arith.constant 0 : i32
    %c0_i32_0 = arith.constant 0 : i32
    %c0_i32_1 = arith.constant 0 : i32
    return %c0_i32, %c0_i32_0 : i32, i32
  }
  func.func @transform_4(%arg0: i32) -> (i32, i32) {
    %c0_i32 = arith.constant 0 : i32
    %c0_i32_0 = arith.constant 0 : i32
    %c0_i32_1 = arith.constant 0 : i32
    return %c0_i32, %c0_i32_0 : i32, i32
  }
  func.func @transform_5(%arg0: i32) -> (i32, i32) {
    %c0_i32 = arith.constant 0 : i32
    %c0_i32_0 = arith.constant 0 : i32
    return %arg0, %c0_i32 : i32, i32
  }
}

</mosaic_0001>

<bundles_post_ra>
// kernel: tpu_custom_call.1
= control target key start
LH: loop header
LB: loop body
LE: loop exit
PB: predicated region body
PF: predicated region fallthrough
CT: control target
= control target key end

     0   :  { %10 = vsyncpa [#allocation3], 0  ;;  %s568_s0 = inlined_call_operand.hbm [shape: bf16[16,42], index: 0, kind: input, shape index: {}]   ;;  %s569_s1 = inlined_call_operand.hbm [shape: bf16[42,128], index: 1, kind: input, shape index: {}]   ;;  %s570_s2 = inlined_call_operand.vmem [shape: f32[1,128], index: 2, kind: input, shape index: {}]   ;;  %s571_s3 = inlined_call_operand.hbm [shape: bf16[128,128], index: 3, kind: input, shape index: {}]   ;;  %s572_s4 = inlined_call_operand.vmem [shape: f32[1,128], index: 4, kind: input, shape index: {}]   ;;  %s573_s5 = inlined_call_operand.hbm [shape: f32[16,128], index: 5, kind: output, shape index: {}]  }
   0x1   :  { %11 = vsyncpa [#allocation6], 0 }
   0x2   :  { %12 = vsyncpa [#allocation4], 0  ;;  %s458_s18 = smov [#allocation5]   ;;  %s459_s20 = smov [#allocation2]  }
   0x3   :  { %s30_s19 = sshll.u32 %s458_s18, 4  ;;  %s18_s21 = sshll.u32 %s459_s20, 4  ;;  %s31_s19 = int_to_ptr.vmem [resolvable:$true] %s30_s19  ;;  %s498_s21 = int_to_ptr.vmem [resolvable:$true] %s18_s21 }
   0x4   :  { %s364_s24 = scalar_lea.hbm %s569_s1, 384 }
   0x5   :  { %p365_p0 = scmp.ne.s32.totalorder %s569_s1, %s364_s24  ;;  %p368_p1 = scmp.lt.u32.totalorder %s364_s24, %s569_s1 }
   0x7   :  { %p370_p2 = pnand %p368_p1, %p365_p0 }
   0x9   :  { %373 = shalt.err (!%p370_p2)
}
   0xa   :  { %s374_s29 = scalar_lea.vmem %s31_s19, 384  ;;  %p379_p4 = scmp.lt.s32.totalorder %s31_s19, %s31_s19 }
   0xb   :  { %p375_p3 = scmp.ne.s32.totalorder %s31_s19, %s374_s29  ;;  %p380_p5 = scmp.lt.s32.totalorder %s374_s29, %s374_s29 }
   0xd   :  { %p381_p6 = por %p380_p5, %p379_p4 }
   0xf   :  { %p382_p7 = pnand %p381_p6, %p375_p3 }
  0x11   :  { %385 = shalt.err (!%p382_p7)
}
  0x12   :  { %s460_s30 = smov 64   ;;  %s461_s6 = smov 4  }
  0x13   :  { %36 = dma.hbm_to_vmem [thread:$0]  %s569_s1, 384, %s31_s19, [#allocation6], %s460_s30, %s460_s30, %s461_s6  }
  0x14   :  { %s386_s11 = scalar_lea.hbm %s568_s0, 128 }
  0x15   :  { %p387_p8 = scmp.ne.s32.totalorder %s568_s0, %s386_s11  ;;  %p390_p9 = scmp.lt.u32.totalorder %s386_s11, %s568_s0 }
  0x17   :  { %p392_p10 = pnand %p390_p9, %p387_p8 }
  0x19   :  { %395 = shalt.err (!%p392_p10)
}
  0x1a   :  { %s396_s16 = scalar_lea.vmem %s498_s21, 128  ;;  %p401_p12 = scmp.lt.s32.totalorder %s498_s21, %s498_s21 }
  0x1b   :  { %p397_p11 = scmp.ne.s32.totalorder %s498_s21, %s396_s16  ;;  %p402_p13 = scmp.lt.s32.totalorder %s396_s16, %s396_s16 }
  0x1d   :  { %p403_p0 = por %p402_p13, %p401_p12 }
  0x1f   :  { %p404_p1 = pnand %p403_p0, %p397_p11 }
  0x21   :  { %407 = shalt.err (!%p404_p1)
}
  0x22   :  { %24 = dma.hbm_to_vmem [thread:$0]  %s568_s0, 128, %s498_s21, [#allocation3], %s460_s30, %s460_s30, %s461_s6  }
  0x23   :  { %s462_s18 = smov [#allocation7]   ;;  %s408_s23 = scalar_lea.hbm %s571_s3, 1024 }
  0x24   :  { %s44_s19 = sshll.u32 %s462_s18, 4  ;;  %p409_p2 = scmp.ne.s32.totalorder %s571_s3, %s408_s23  ;;  %s45_s19 = int_to_ptr.vmem [resolvable:$true] %s44_s19 }
  0x25   :  { %p412_p3 = scmp.lt.u32.totalorder %s408_s23, %s571_s3 }
  0x27   :  { %p414_p4 = pnand %p412_p3, %p409_p2 }
  0x29   :  { %417 = shalt.err (!%p414_p4)
}
  0x2a   :  { %s418_s28 = scalar_lea.vmem %s45_s19, 1024  ;;  %p423_p6 = scmp.lt.s32.totalorder %s45_s19, %s45_s19 }
  0x2b   :  { %p419_p5 = scmp.ne.s32.totalorder %s45_s19, %s418_s28  ;;  %p424_p7 = scmp.lt.s32.totalorder %s418_s28, %s418_s28 }
  0x2d   :  { %p425_p8 = por %p424_p7, %p423_p6 }
  0x2f   :  { %p426_p9 = pnand %p425_p8, %p419_p5 }
  0x31   :  { %429 = shalt.err (!%p426_p9)
}
  0x32   :  { %50 = dma.hbm_to_vmem [thread:$0]  %s571_s3, 1024, %s45_s19, [#allocation6], %s460_s30, %s460_s30, %s461_s6  }
  0x33   :  { %452 = dma.done.wait [#allocation3], 128  }
  0x34   :  { %453 = vsyncadd [#allocation3], 4294967168 }
  0x35   :  { %454 = dma.done.wait [#allocation6], 1408  }
  0x36   :  { %455 = vsyncadd [#allocation6], 4294965888  ;;  %v463_v0 = vmov 0.0   ;;  %vm464_vm0 = vmmov 0   ;;  %v352_v1 = vld [vmem:[#allocation5] sm:$0xff]   ;;  %v353_v2 = vld [vmem:[#allocation5 + $0x8] sm:$0xff]  }
  0x37   :  { %312 = vmatprep.subr.bf16.mxu0 %v463_v0  ;;  %318 = vmatprep.mubr.msk.bf16.mxu0 %vm464_vm0, %v463_v0  ;;  %v354_v3 = vld [vmem:[#allocation5 + $0x10] sm:$0x1f]   ;;  %vm104_vm1 = vcmask 1044480   ;;  %v356_v4 = vld [vmem:[#allocation7] sm:$0xff]   ;;  %v357_v5 = vld [vmem:[#allocation7 + $0x8] sm:$0xff]   ;;  %vm100_vm2 = vcmask 343040  }
  0x38   :  { %322 = vmatprep.subr.bf16.mxu1 %v463_v0  ;;  %338 = vmatprep.mubr.msk.bf16.mxu1 %vm464_vm0, %v463_v0  ;;  %v106_v6 = vsel %vm104_vm1, %v354_v3, 0  ;;  %v355_v7 = vld [vmem:[#allocation2] sm:$0xff]   ;;  %v358_v8 = vld [vmem:[#allocation7 + $0x10] sm:$0xff]   ;;  %v359_v9 = vld [vmem:[#allocation7 + $0x18] sm:$0xff]   ;;  %s465_s7 = smov [#allocation8]  }
  0x39   :  { %313 = vmatpush3.bf16.msra.mxu0 %v352_v1  ;;  %323 = vmatpush3.bf16.msra.mxu1 %v356_v4  ;;  %v360_v10 = vld [vmem:[#allocation7 + $0x20] sm:$0xff]   ;;  %v361_v11 = vld [vmem:[#allocation7 + $0x28] sm:$0xff]   ;;  %v362_v12 = vld [vmem:[#allocation7 + $0x30] sm:$0xff]   ;;  %s271_s8 = sshll.u32 %s465_s7, 4  ;;  %s272_s8 = int_to_ptr.vmem [resolvable:$true] %s271_s8 }
  0x3a   :  { %314 = vmatprep.subr.bf16.mxu0 %v463_v0  ;;  %324 = vmatprep.subr.bf16.mxu1 %v463_v0  ;;  %v363_v13 = vld [vmem:[#allocation7 + $0x38] sm:$0xff]   ;;  %v284_v14 = vld [vmem:[%s570_s2] ss:$0 sm:$0xff]  ;;  %s430_s2 = scalar_lea.vmem %s272_s8, 256  ;;  %p435_p11 = scmp.lt.s32.totalorder %s272_s8, %s272_s8 }
  0x3b   :  { %v290_v24 = vld [vmem:[%s572_s4] ss:$0 sm:$0xff]  ;;  %p431_p10 = scmp.ne.s32.totalorder %s272_s8, %s430_s2  ;;  %p436_p12 = scmp.lt.s32.totalorder %s430_s2, %s430_s2 }
  0x3d   :  { %315 = vmatpush3.bf16.msra.mxu0 %v353_v2  ;;  %325 = vmatpush3.bf16.msra.mxu1 %v357_v5  ;;  %p437_p13 = por %p436_p12, %p435_p11 }
  0x3e   :  { %316 = vmatprep.subr.bf16.mxu0 %v463_v0  ;;  %326 = vmatprep.subr.bf16.mxu1 %v463_v0 }
  0x3f   :  { %p438_p0 = pnand %p437_p13, %p431_p10 }
  0x41   :  { %317 = vmatpush3.bf16.msra.mxu0 %v106_v6  ;;  %327 = vmatpush3.bf16.msra.mxu1 %v358_v8 }
  0x42   :  { %328 = vmatprep.subr.bf16.mxu1 %v463_v0 }
  0x44   :  { %319 = vmatmul.mubr.msk.bf16.vlgmr.msra.gmra.mrb[0].mxu0 %vm100_vm2, %v355_v7 }
  0x45   :  { %329 = vmatpush3.bf16.msra.mxu1 %v359_v9 }
  0x46   :  { %330 = vmatprep.subr.bf16.mxu1 %v463_v0 }
  0x49   :  { %331 = vmatpush3.bf16.msra.mxu1 %v360_v10 }
  0x4a   :  { %332 = vmatprep.subr.bf16.mxu1 %v463_v0 }
  0x4d   :  { %333 = vmatpush3.bf16.msra.mxu1 %v361_v11 }
  0x4e   :  { %334 = vmatprep.subr.bf16.mxu1 %v463_v0 }
  0x51   :  { %335 = vmatpush3.bf16.msra.mxu1 %v362_v12 }
  0x52   :  { %336 = vmatprep.subr.bf16.mxu1 %v463_v0 }
  0x55   :  { %337 = vmatpush3.bf16.msra.mxu1 %v363_v13 }
 0x117   :  { %v142_v15 = vpop.f32.mrb[0].mxu0 }
 0x118   :  { %v143_v16 = vadd.f32 %v284_v14, %v142_v15  ;;  %v320_v17 = vpop.f32.mrb[1].mxu0 }
 0x119   :  { %v145_v18 = vpop.f32.mrb[2].mxu0 }
 0x11a   :  { %v146_v19 = vadd.f32 %v284_v14, %v145_v18  ;;  %v321_v20 = vpop.f32.mrb[3].mxu0  ;;  %v149_v21 = vmax.f32 %v143_v16, 0.0 }
 0x11c   :  { %v150_v22 = vmax.f32 %v146_v19, 0.0 }
 0x11e   :  { %v151_v23 = vpack.c.bf16 %v150_v22, %v149_v21 }
 0x120   :  { %339 = vmatmul.mubr.bf16.vlgmr.msra.gmra.mrb[0].mxu1 %v151_v23 }
 0x1f3   :  { %v257_v25 = vpop.f32.mrb[0].mxu1 }
 0x1f4   :  { %v258_v26 = vadd.f32 %v290_v24, %v257_v25  ;;  %v340_v27 = vpop.f32.mrb[1].mxu1 }
 0x1f5   :  { %v260_v28 = vpop.f32.mrb[2].mxu1 }
 0x1f6   :  { %264 = vst [vmem:[#allocation8] sm:$0xff] %v258_v26  ;;  %v261_v29 = vadd.f32 %v290_v24, %v260_v28  ;;  %v341_v30 = vpop.f32.mrb[3].mxu1 }
 0x1f8   :  { %265 = vst [vmem:[#allocation8 + $0x8] sm:$0xff] %v261_v29 }
 0x1f9   :  { %441 = shalt.err (!%p438_p0)
}
 0x1fa   :  { %s442_s10 = scalar_lea.hbm %s573_s5, 256 }
 0x1fb   :  { %p443_p1 = scmp.ne.s32.totalorder %s573_s5, %s442_s10  ;;  %p446_p2 = scmp.lt.u32.totalorder %s442_s10, %s573_s5 }
 0x1fd   :  { %p448_p3 = pnand %p446_p2, %p443_p1 }
 0x1ff   :  { %451 = shalt.err (!%p448_p3)
}
 0x200   :  { %s466_s15 = smov 128   ;;  %s467_s16 = smov 8  }
 0x201   :  { %277 = dma.vmem_to_hbm [thread:$0]  %s272_s8, 256, %s573_s5, [#allocation4], %s466_s15, %s466_s15, %s467_s16  }
 0x202   :  { %456 = dma.done.wait [#allocation4], 256  }
 0x203   :  { %457 = vsyncadd [#allocation4], 4294967040 }
 0x204   :  { %281 = vsyncpa [#allocation3], 1 }
 0x205   :  { %282 = vsyncpa [#allocation6], 1 }
 0x206   :  { %283 = vsyncpa [#allocation4], 1 }

</bundles_post_ra>
